<compile_context>
chip_gen: v7x
topology: tpu7x:2x2x1
jax: 0.10.0
libtpu: 0.0.40
codegen_flags: <defaults>
</compile_context>

<pallas_src>
import functools
import math

import jax
import jax.numpy as jnp
import numpy as np
from jax.experimental import pallas as pl
from jax.experimental.pallas import tpu as pltpu

_LOG2_E = 1.4426950408889634  # 1 / ln(2)


def _lambda_rank_kernel(ts_c_ref, ts_r_ref, g_c_ref, g_r_ref,
                        invd_c_ref, invd_r_ref, ys_c_ref, ys_r_ref,
                        out_ref, *, ln_eps, log2_eps):
    """One (tm, tn) pairwise tile; accumulates lane-dense partial sums."""
    j = pl.program_id(1)

    @pl.when(j == 0)
    def _():
        out_ref[...] = jnp.zeros_like(out_ref)

    # Pair mask: (ts_i - ts_j) > 0.  Invalid positions (non-finite label,
    # index >= k, padding) were planted as NaN in the wrapper, so they compare
    # False here — no isfinite / iota work in the N^2 body.
    mask = (ts_c_ref[...] - ts_r_ref[...]) > 0.0

    # w' = LOG2_E * |1/D_i - 1/D_j| * |G_i - G_j|  (sqrt(LOG2_E) pre-folded
    # into both 1-D vectors); masked pairs get w'=0 -> exactly 0 loss below.
    w = (jnp.abs(invd_c_ref[...] - invd_r_ref[...])
         * jnp.abs(g_c_ref[...] - g_r_ref[...]))
    w = jnp.where(mask, w, 0.0)

    # z = sigma * (ys_i - ys_j)   (sigma pre-folded into ys in the wrapper).
    z = ys_c_ref[...] - ys_r_ref[...]
    # Stable log(sigmoid(z)); the torch +-1e8 clip is redundant after clamps.
    log_sig = jnp.minimum(z, 0.0) - jnp.log(1.0 + jnp.exp(-jnp.abs(z)))
    inner = jnp.maximum(log_sig, ln_eps)          # log(max(sigmoid(z), eps))
    losses = jnp.maximum(w * inner, log2_eps)     # log2(max(p**w, eps)); w==0 -> 0

    # Lane-dense partial sum accumulated across the j (reduction) axis into
    # row 0 of the (8, tn) output block.
    psum = jnp.sum(losses, axis=0, keepdims=True)
    out_ref[0:1, :] = out_ref[0:1, :] + psum


def _round_up(x, m):
    return ((x + m - 1) // m) * m


def lambda_rank_loss(preds, labels, k=None, eps=1e-10, mu=10.0, sigma=1.0,
                     *, tile_m=256, tile_n=2048):
    """Pallas-backed equivalent of LambdaRankLoss.forward (mu unused, as in PyTorch)."""
    del mu  # unused by the PyTorch forward
    preds = jnp.asarray(preds, jnp.float32)
    labels = jnp.asarray(labels, jnp.float32)
    n = preds.shape[0]
    k_eff = n if k is None else max(0, min(int(k), n))

    # ---- O(N) glue in plain JAX: sort / gather / discounts / maxDCG / G -----
    order = jnp.argsort(-preds)                    # descending sort of preds
    ys = preds[order]                              # y_pred_sorted
    ts = labels[order]                             # true_sorted_by_preds (unclamped)
    yt = -jnp.sort(-labels)                        # y_true_sorted (descending)

    pos = jnp.arange(1, n + 1, dtype=jnp.float32)
    d = jnp.log2(1.0 + pos)                        # discounts D
    inv_d = 1.0 / d
    idx = jnp.arange(n)
    gains = (jnp.exp2(jnp.maximum(yt, 0.0)) - 1.0) / d
    gains = jnp.where(idx < k_eff, gains, 0.0)
    maxdcg = jnp.maximum(jnp.sum(gains), eps)
    g = (jnp.exp2(jnp.maximum(ts, 0.0)) - 1.0) / maxdcg

    # Validity (finite label & inside the ndcg@k window) folded into ts as NaN.
    valid = jnp.isfinite(ts) & (idx < k_eff)
    ts_m = jnp.where(valid, ts, jnp.nan)

    # Fold constants into the 1-D vectors (saves per-element multiplies).
    s = np.float32(math.sqrt(_LOG2_E))
    inv_d_s = inv_d * s
    g_s = g * s
    ys_s = jnp.float32(sigma) * ys

    # ---- pad to tile multiples (row / col copies padded independently) ------
    tm = min(_round_up(int(tile_m), 8), _round_up(n, 8))
    tn = min(_round_up(int(tile_n), 128), _round_up(n, 128))
    np_m = _round_up(n, tm)
    np_n = _round_up(n, tn)
    gm, gn = np_m // tm, np_n // tn

    def col(x, fill):
        return jnp.pad(x, (0, np_m - n), constant_values=fill).reshape(np_m, 1)

    def row(x, fill):
        return jnp.pad(x, (0, np_n - n), constant_values=fill).reshape(1, np_n)

    nanf = float("nan")
    args = (col(ts_m, nanf),    row(ts_m, nanf),
            col(g_s, 0.0),      row(g_s, 0.0),
            col(inv_d_s, 0.0),  row(inv_d_s, 0.0),
            col(ys_s, 0.0),     row(ys_s, 0.0))

    col_spec = pl.BlockSpec((tm, 1), lambda i, j: (i, 0))
    row_spec = pl.BlockSpec((1, tn), lambda i, j: (0, j))

    kernel = functools.partial(_lambda_rank_kernel,
                               ln_eps=float(math.log(eps)),
                               log2_eps=float(math.log2(eps)))

    partial_sums = pl.pallas_call(
        kernel,
        out_shape=jax.ShapeDtypeStruct((gm * 8, tn), jnp.float32),
        grid=(gm, gn),
        in_specs=[col_spec, row_spec] * 4,
        out_specs=pl.BlockSpec((8, tn), lambda i, j: (i, 0)),
        compiler_params=pltpu.CompilerParams(
            dimension_semantics=("parallel", "arbitrary"),
            vmem_limit_bytes=48 * 1024 * 1024),
    )(*args)

    return -jnp.sum(partial_sums)


def _reference(preds, labels, k=None, eps=1e-10, sigma=1.0):
    """Plain-JAX transcription of the PyTorch forward (for verification)."""
    preds = preds.astype(jnp.float32)
    labels = labels.astype(jnp.float32)
    n = preds.shape[0]
    order = jnp.argsort(-preds)
    y_pred_sorted = preds[order][None, :]
    y_true_sorted = (-jnp.sort(-labels))[None, :]
    tsp = labels[order][None, :]
    true_diffs = tsp[:, :, None] - tsp[:, None, :]
    pairs_mask = jnp.isfinite(true_diffs) & (true_diffs > 0)
    k_eff = n if k is None else max(0, min(int(k), n))
    idx = jnp.arange(n)
    ndcg_mask = (idx[:, None] < k_eff) & (idx[None, :] < k_eff)
    tsp_c = jnp.maximum(tsp, 0.0)
    yts_c = jnp.maximum(y_true_sorted, 0.0)
    D = jnp.log2(1.0 + jnp.arange(1, n + 1, dtype=jnp.float32))[None, :]
    gains = (jnp.power(2.0, yts_c) - 1.0) / D
    gains = jnp.where(idx[None, :] < k_eff, gains, 0.0)
    maxdcg = jnp.maximum(jnp.sum(gains, axis=-1), eps)
    G = (jnp.power(2.0, tsp_c) - 1.0) / maxdcg[:, None]
    weights = (jnp.abs(1.0 / D[:, :, None] - 1.0 / D[:, None, :])
               * jnp.abs(G[:, :, None] - G[:, None, :]))
    sd = jnp.clip(y_pred_sorted[:, :, None] - y_pred_sorted[:, None, :], -1e8, 1e8)
    sd = jnp.where(jnp.isnan(sd), 0.0, sd)
    wp = jnp.maximum(jnp.power(jnp.maximum(jax.nn.sigmoid(sigma * sd), eps), weights), eps)
    losses = jnp.log2(wp)
    mask = pairs_mask & ndcg_mask[None]
    return -jnp.sum(jnp.where(mask, losses, 0.0))


if __name__ == "__main__":
    key = jax.random.PRNGKey(0)
    k1, k2, k3, k4, k5, k6 = jax.random.split(key, 6)

    # Small list (matches the ranking-loss use in the cost model): k=None.
    n = 8
    preds = jax.random.normal(k1, (n,), dtype=jnp.float32)
    labels = jax.random.uniform(k2, (n,), minval=0.0, maxval=5.0, dtype=jnp.float32)
    loss = jax.block_until_ready(lambda_rank_loss(preds, labels))
    ref = _reference(preds, labels)
    np.testing.assert_allclose(np.asarray(loss), np.asarray(ref), rtol=2e-4, atol=1e-4)

    # Larger list exercising padding and the ndcg@k mask.
    n2, k_at = 200, 50
    preds2 = jax.random.normal(k3, (n2,), dtype=jnp.float32)
    labels2 = jax.random.uniform(k4, (n2,), minval=0.0, maxval=5.0, dtype=jnp.float32)
    loss2 = jax.block_until_ready(lambda_rank_loss(preds2, labels2, k=k_at))
    ref2 = _reference(preds2, labels2, k=k_at)
    np.testing.assert_allclose(np.asarray(loss2), np.asarray(ref2), rtol=2e-4, atol=1e-4)

    # Multi-tile grid in both axes (parallel row tiles + arbitrary reduction).
    n3 = 300
    preds3 = jax.random.normal(k5, (n3,), dtype=jnp.float32)
    labels3 = jax.random.uniform(k6, (n3,), minval=0.0, maxval=5.0, dtype=jnp.float32)
    loss3 = jax.block_until_ready(
        lambda_rank_loss(preds3, labels3, tile_m=64, tile_n=128))
    ref3 = _reference(preds3, labels3)
    np.testing.assert_allclose(np.asarray(loss3), np.asarray(ref3), rtol=5e-4, atol=5e-4)

    print("KERNEL_OK")
</pallas_src>

<mosaic_0001>
module attributes {stable_mosaic.version = 11 : i64} {
  func.func @_lambda_rank_kernel(%arg0: i32, %arg1: i32, %arg2: memref<8x1xf32, #tpu.memory_space<vmem>>, %arg3: memref<1x128xf32, #tpu.memory_space<vmem>>, %arg4: memref<8x1xf32, #tpu.memory_space<vmem>>, %arg5: memref<1x128xf32, #tpu.memory_space<vmem>>, %arg6: memref<8x1xf32, #tpu.memory_space<vmem>>, %arg7: memref<1x128xf32, #tpu.memory_space<vmem>>, %arg8: memref<8x1xf32, #tpu.memory_space<vmem>>, %arg9: memref<1x128xf32, #tpu.memory_space<vmem>>, %arg10: memref<8x128xf32, #tpu.memory_space<vmem>>) attributes {dimension_semantics = [#tpu.dimension_semantics<parallel>, #tpu.dimension_semantics<arbitrary>], iteration_bounds = array<i64: 1, 1>, scalar_prefetch = 0 : i64, scratch_operands = 0 : i64, tpu.core_type = #tpu.core_type<tc>, window_params = [{transform_indices = @transform_0, window_bounds = array<i64: 8, 1>}, {transform_indices = @transform_1, window_bounds = array<i64: 1, 128>}, {transform_indices = @transform_2, window_bounds = array<i64: 8, 1>}, {transform_indices = @transform_3, window_bounds = array<i64: 1, 128>}, {transform_indices = @transform_4, window_bounds = array<i64: 8, 1>}, {transform_indices = @transform_5, window_bounds = array<i64: 1, 128>}, {transform_indices = @transform_6, window_bounds = array<i64: 8, 1>}, {transform_indices = @transform_7, window_bounds = array<i64: 1, 128>}, {transform_indices = @transform_8, window_bounds = array<i64: 8, 128>}]} {
    %c0_i32 = arith.constant 0 : i32
    %0 = arith.cmpi eq, %arg1, %c0_i32 : i32
    %1 = arith.extui %0 : i1 to i32
    %c0_i32_0 = arith.constant 0 : i32
    %2 = arith.cmpi ne, %1, %c0_i32_0 : i32
    scf.if %2 {
      %cst_27 = arith.constant 0.000000e+00 : f32
      %50 = vector.broadcast %cst_27 : f32 to vector<8x128xf32>
      %c0_28 = arith.constant 0 : index
      %c0_29 = arith.constant 0 : index
      %51 = vector.load %arg10[%c0_28, %c0_29] : memref<8x128xf32, #tpu.memory_space<vmem>>, vector<8x128xf32>
      tpu.vector_store %arg10[%c0_28, %c0_29], %50 {strides = array<i32>} : memref<8x128xf32, #tpu.memory_space<vmem>>, vector<8x128xf32>,
    } else {
    }
    %c0 = arith.constant 0 : index
    %c0_1 = arith.constant 0 : index
    %3 = vector.load %arg2[%c0, %c0_1] : memref<8x1xf32, #tpu.memory_space<vmem>>, vector<8x1xf32>
    %c0_2 = arith.constant 0 : index
    %c0_3 = arith.constant 0 : index
    %4 = vector.load %arg3[%c0_2, %c0_3] : memref<1x128xf32, #tpu.memory_space<vmem>>, vector<1x128xf32>
    %5 = vector.broadcast %3 : vector<8x1xf32> to vector<8x128xf32>
    %6 = vector.broadcast %4 : vector<1x128xf32> to vector<8x128xf32>
    %7 = arith.subf %5, %6 : vector<8x128xf32>
    %cst = arith.constant 0.000000e+00 : f32
    %8 = vector.broadcast %cst : f32 to vector<8x128xf32>
    %9 = arith.cmpf ogt, %7, %8 : vector<8x128xf32>
    %c0_4 = arith.constant 0 : index
    %c0_5 = arith.constant 0 : index
    %10 = vector.load %arg6[%c0_4, %c0_5] : memref<8x1xf32, #tpu.memory_space<vmem>>, vector<8x1xf32>
    %c0_6 = arith.constant 0 : index
    %c0_7 = arith.constant 0 : index
    %11 = vector.load %arg7[%c0_6, %c0_7] : memref<1x128xf32, #tpu.memory_space<vmem>>, vector<1x128xf32>
    %12 = vector.broadcast %10 : vector<8x1xf32> to vector<8x128xf32>
    %13 = vector.broadcast %11 : vector<1x128xf32> to vector<8x128xf32>
    %14 = arith.subf %12, %13 : vector<8x128xf32>
    %15 = math.absf %14 : vector<8x128xf32>
    %c0_8 = arith.constant 0 : index
    %c0_9 = arith.constant 0 : index
    %16 = vector.load %arg4[%c0_8, %c0_9] : memref<8x1xf32, #tpu.memory_space<vmem>>, vector<8x1xf32>
    %c0_10 = arith.constant 0 : index
    %c0_11 = arith.constant 0 : index
    %17 = vector.load %arg5[%c0_10, %c0_11] : memref<1x128xf32, #tpu.memory_space<vmem>>, vector<1x128xf32>
    %18 = vector.broadcast %16 : vector<8x1xf32> to vector<8x128xf32>
    %19 = vector.broadcast %17 : vector<1x128xf32> to vector<8x128xf32>
    %20 = arith.subf %18, %19 : vector<8x128xf32>
    %21 = math.absf %20 : vector<8x128xf32>
    %22 = arith.mulf %15, %21 : vector<8x128xf32>
    %cst_12 = arith.constant 0.000000e+00 : f32
    %23 = vector.broadcast %cst_12 : f32 to vector<8x128xf32>
    %24 = arith.select %9, %22, %23 : vector<8x128xi1>, vector<8x128xf32>
    %c0_13 = arith.constant 0 : index
    %c0_14 = arith.constant 0 : index
    %25 = vector.load %arg8[%c0_13, %c0_14] : memref<8x1xf32, #tpu.memory_space<vmem>>, vector<8x1xf32>
    %c0_15 = arith.constant 0 : index
    %c0_16 = arith.constant 0 : index
    %26 = vector.load %arg9[%c0_15, %c0_16] : memref<1x128xf32, #tpu.memory_space<vmem>>, vector<1x128xf32>
    %27 = vector.broadcast %25 : vector<8x1xf32> to vector<8x128xf32>
    %28 = vector.broadcast %26 : vector<1x128xf32> to vector<8x128xf32>
    %29 = arith.subf %27, %28 : vector<8x128xf32>
    %cst_17 = arith.constant 0.000000e+00 : f32
    %30 = vector.broadcast %cst_17 : f32 to vector<8x128xf32>
    %31 = arith.minimumf %29, %30 : vector<8x128xf32>
    %32 = math.absf %29 : vector<8x128xf32>
    %cst_18 = arith.constant 0.000000e+00 : f32
    %33 = vector.broadcast %cst_18 : f32 to vector<8x128xf32>
    %34 = arith.subf %33, %32 : vector<8x128xf32>
    %35 = math.exp %34 : vector<8x128xf32>
    %cst_19 = arith.constant 1.000000e+00 : f32
    %36 = vector.broadcast %cst_19 : f32 to vector<8x128xf32>
    %37 = arith.addf %36, %35 : vector<8x128xf32>
    %38 = math.log %37 : vector<8x128xf32>
    %39 = arith.subf %31, %38 : vector<8x128xf32>
    %cst_20 = arith.constant -23.0258503 : f32
    %40 = vector.broadcast %cst_20 : f32 to vector<8x128xf32>
    %41 = arith.maximumf %39, %40 : vector<8x128xf32>
    %42 = arith.mulf %24, %41 : vector<8x128xf32>
    %cst_21 = arith.constant -33.2192802 : f32
    %43 = vector.broadcast %cst_21 : f32 to vector<8x128xf32>
    %44 = arith.maximumf %42, %43 : vector<8x128xf32>
    %cst_22 = arith.constant dense<0.000000e+00> : vector<128xf32>
    %45 = vector.multi_reduction <add>, %44, %cst_22 [0] : vector<8x128xf32> to vector<128xf32>
    %46 = vector.shape_cast %45 : vector<128xf32> to vector<1x128xf32>
    %c0_23 = arith.constant 0 : index
    %c0_24 = arith.constant 0 : index
    %47 = vector.load %arg10[%c0_23, %c0_24] : memref<8x128xf32, #tpu.memory_space<vmem>>, vector<1x128xf32>
    %48 = arith.addf %47, %46 : vector<1x128xf32>
    %c0_25 = arith.constant 0 : index
    %c0_26 = arith.constant 0 : index
    %49 = vector.load %arg10[%c0_25, %c0_26] : memref<8x128xf32, #tpu.memory_space<vmem>>, vector<1x128xf32>
    tpu.vector_store %arg10[%c0_25, %c0_26], %48 {strides = array<i32>} : memref<8x128xf32, #tpu.memory_space<vmem>>, vector<1x128xf32>,
    return
  }
  func.func @transform_0(%arg0: i32, %arg1: i32) -> (i32, i32) {
    %c0_i32 = arith.constant 0 : i32
    %c0_i32_0 = arith.constant 0 : i32
    return %arg0, %c0_i32 : i32, i32
  }
  func.func @transform_1(%arg0: i32, %arg1: i32) -> (i32, i32) {
    %c0_i32 = arith.constant 0 : i32
    %c0_i32_0 = arith.constant 0 : i32
    return %c0_i32, %arg1 : i32, i32
  }
  func.func @transform_2(%arg0: i32, %arg1: i32) -> (i32, i32) {
    %c0_i32 = arith.constant 0 : i32
    %c0_i32_0 = arith.constant 0 : i32
    return %arg0, %c0_i32 : i32, i32
  }
  func.func @transform_3(%arg0: i32, %arg1: i32) -> (i32, i32) {
    %c0_i32 = arith.constant 0 : i32
    %c0_i32_0 = arith.constant 0 : i32
    return %c0_i32, %arg1 : i32, i32
  }
  func.func @transform_4(%arg0: i32, %arg1: i32) -> (i32, i32) {
    %c0_i32 = arith.constant 0 : i32
    %c0_i32_0 = arith.constant 0 : i32
    return %arg0, %c0_i32 : i32, i32
  }
  func.func @transform_5(%arg0: i32, %arg1: i32) -> (i32, i32) {
    %c0_i32 = arith.constant 0 : i32
    %c0_i32_0 = arith.constant 0 : i32
    return %c0_i32, %arg1 : i32, i32
  }
  func.func @transform_6(%arg0: i32, %arg1: i32) -> (i32, i32) {
    %c0_i32 = arith.constant 0 : i32
    %c0_i32_0 = arith.constant 0 : i32
    return %arg0, %c0_i32 : i32, i32
  }
  func.func @transform_7(%arg0: i32, %arg1: i32) -> (i32, i32) {
    %c0_i32 = arith.constant 0 : i32
    %c0_i32_0 = arith.constant 0 : i32
    return %c0_i32, %arg1 : i32, i32
  }
  func.func @transform_8(%arg0: i32, %arg1: i32) -> (i32, i32) {
    %c0_i32 = arith.constant 0 : i32
    %c0_i32_0 = arith.constant 0 : i32
    return %arg0, %c0_i32 : i32, i32
  }
}

</mosaic_0001>

<bundles_post_ra>
// kernel: tpu_custom_call.1
= control target key start
LH: loop header
LB: loop body
LE: loop exit
PB: predicated region body
PF: predicated region fallthrough
CT: control target
= control target key end

     0   :  { %v168_v2 = vmov 0   ;;  %s252_s0 = inlined_call_operand.vmem [shape: f32[8,1], index: 0, kind: input, shape index: {}]   ;;  %s253_s1 = inlined_call_operand.vmem [shape: f32[1,128], index: 1, kind: input, shape index: {}]   ;;  %s254_s2 = inlined_call_operand.vmem [shape: f32[8,1], index: 2, kind: input, shape index: {}]   ;;  %s255_s3 = inlined_call_operand.vmem [shape: f32[1,128], index: 3, kind: input, shape index: {}]   ;;  %s256_s4 = inlined_call_operand.vmem [shape: f32[8,1], index: 4, kind: input, shape index: {}]   ;;  %s257_s5 = inlined_call_operand.vmem [shape: f32[1,128], index: 5, kind: input, shape index: {}]   ;;  %s258_s6 = inlined_call_operand.vmem [shape: f32[8,1], index: 6, kind: input, shape index: {}]   ;;  %s259_s7 = inlined_call_operand.vmem [shape: f32[1,128], index: 7, kind: input, shape index: {}]   ;;  %s260_s8 = inlined_call_operand.hbm [shape: f32[8,128], index: 8, kind: output, shape index: {}]  }
   0x1   :  { %v82_v0 = vld [vmem:[%s258_s6] sm:$0xff]  ;;  %138 = vset.pattern.permute.xlu0 %v168_v2  ;;  %139 = vset.pattern.permute.xlu1 %v168_v2 }
   0x2   :  { %v65_v1 = vld [vmem:[%s254_s2] sm:$0xff] }
   0x3   :  { %13 = vsyncpa [#allocation3], 0  ;;  %86 = vperm.xlu0 %138, %v82_v0   ;;  %69 = vperm.xlu1 %139, %v65_v1   ;;  %v50_v3 = vld [vmem:[%s256_s4] sm:$0xff]  ;;  %v169_v5 = vmov 0.0  }
   0x4   :  { %v35_v4 = vld [vmem:[%s252_s0] sm:$0xff]  ;;  %34 = vst [vmem:[#allocation2] sm:$0xff] %v169_v5 }
   0x5   :  { %v134_v6 = vld [vmem:[%s259_s7] ss:$0 sm:$0xff] }
   0x6   :  { %v133_v15 = vld [vmem:[%s255_s3] ss:$0 sm:$0xff] }
   0x7   :  { %54 = vperm.xlu0 %138, %v50_v3   ;;  %39 = vperm.xlu1 %139, %v35_v4   ;;  %v132_v16 = vld [vmem:[%s257_s5] ss:$0 sm:$0xff] }
   0x8   :  { %v131_v20 = vld [vmem:[%s253_s1] ss:$0 sm:$0xff]  ;;  %s170_s1 = smov [#allocation2]  }
   0x9   :  { %s123_s3 = sshll.u32 %s170_s1, 4  ;;  %s124_s3 = int_to_ptr.vmem [resolvable:$true] %s123_s3 }
   0xa   :  { %s144_s5 = scalar_lea.vmem %s124_s3, 128  ;;  %p149_p1 = scmp.lt.s32.totalorder %s124_s3, %s124_s3 }
   0xb   :  { %v114_v39 = vld [vmem:[#allocation2] sm:$0x1]  ;;  %p145_p0 = scmp.ne.s32.totalorder %s124_s3, %s144_s5  ;;  %p150_p2 = scmp.lt.s32.totalorder %s144_s5, %s144_s5 }
   0xd   :  { %p151_p3 = por %p150_p2, %p149_p1 }
   0xf   :  { %p152_p4 = pnand %p151_p3, %p145_p0 }
  0x82   :  { %v87_v7 = vpop.permute.xlu0 %86  ;;  %v70_v14 = vpop.permute.xlu1 %69 }
  0x83   :  { %v95_v8 = vsub.f32 %v87_v7, %v134_v6  ;;  %v78_v18 = vsub.f32 %v70_v14, %v133_v15 }
  0x85   :  { %v97_v9 = vand.u32 2147483647, %v95_v8  ;;  %v79_v22 = vand.u32 2147483647, %v78_v18  ;;  %v96_v26 = vmin.f32 %v95_v8, 0.0 }
  0x86   :  { %v55_v17 = vpop.permute.xlu0 %54  ;;  %v40_v21 = vpop.permute.xlu1 %39 }
  0x87   :  { %v98_v10 = vsub.f32 0.0, %v97_v9  ;;  %v63_v19 = vsub.f32 %v55_v17, %v132_v16  ;;  %v48_v24 = vsub.f32 %v40_v21, %v131_v20 }
  0x89   :  { %v99_v11 = vmul.f32 1.442695, %v98_v10  ;;  %v64_v23 = vand.u32 2147483647, %v63_v19  ;;  %vm49_vm0 = vcmp.gt.f32.partialorder %v48_v24, 0.0 }
  0x8b   :  { %140 = vpow2.f32 %v99_v11  ;;  %v80_v28 = vmul.f32 %v79_v22, %v64_v23 }
  0x8d   :  { %v81_v31 = vsel %vm49_vm0, %v80_v28, 0.0 }
  0x95   :  { %v141_v12 = vpop.eup %140 }
  0x96   :  { %v101_v13 = vadd.f32 1.0, %v141_v12 }
  0x98   :  { %142 = vlog2.f32 %v101_v13 }
  0xa2   :  { %v143_v25 = vpop.eup %142 }
  0xa3   :  { %v103_v27 = vmul.f32 0.6931472, %v143_v25 }
  0xa5   :  { %v104_v29 = vsub.f32 %v96_v26, %v103_v27 }
  0xa7   :  { %v105_v30 = vmax.f32 %v104_v29, -23.02585 }
  0xa9   :  { %v106_v32 = vmul.f32 %v105_v30, %v81_v31 }
  0xab   :  { %v107_v33 = vmax.f32 %v106_v32, -33.21928 }
  0xad   :  { %v108_v34 = vrot.slane %v107_v33, 4 }
  0xaf   :  { %v109_v35 = vadd.f32 %v108_v34, %v107_v33 }
  0xb1   :  { %v110_v36 = vrot.slane %v109_v35, 2 }
  0xb3   :  { %v111_v37 = vadd.f32 %v110_v36, %v109_v35 }
  0xb5   :  { %v112_v38 = vrot.slane %v111_v37, 1 }
  0xb7   :  { %v113_v40 = vadd.f32 %v112_v38, %v111_v37 }
  0xb9   :  { %v115_v41 = vadd.f32 %v114_v39, %v113_v40 }
  0xbb   :  { %116 = vst [vmem:[#allocation2] sm:$0x1] %v115_v41 }
  0xbc   :  { %155 = shalt.err (!%p152_p4)
}
  0xbd   :  { %s156_s18 = scalar_lea.hbm %s260_s8, 128 }
  0xbe   :  { %p157_p5 = scmp.ne.s32.totalorder %s260_s8, %s156_s18  ;;  %p160_p6 = scmp.lt.u32.totalorder %s156_s18, %s260_s8 }
  0xc0   :  { %p162_p7 = pnand %p160_p6, %p157_p5 }
  0xc2   :  { %165 = shalt.err (!%p162_p7)
}
  0xc3   :  { %126 = dma.vmem_to_hbm [thread:$0]  %s124_s3, 128, %s260_s8, [#allocation3]  }
  0xc4   :  { %166 = dma.done.wait [#allocation3], 128  }
  0xc5   :  { %167 = vsyncadd [#allocation3], 4294967168 }
  0xc6   :  { %130 = vsyncpa [#allocation3], 1 }

</bundles_post_ra>
